<compile_context>
chip_gen: v5e
topology: v5e:2x2
jax: 0.10.0
libtpu: 0.0.40
codegen_flags: <defaults>
</compile_context>

<pallas_src>
import jax
import jax.numpy as jnp
import numpy as np
from jax import lax
from jax.experimental import pallas as pl
from jax.experimental.pallas import tpu as pltpu

EMB_SIZE = 64
NUM_HEADS = 2
HEAD_DIM = EMB_SIZE // NUM_HEADS


def mha_kernel(x_ref, wqkv_ref, bqkv_ref, wprojh_ref, bproj_ref, o_ref):
    """One grid step = one batch element.

    x_ref:      (N, E)      f32   (this batch's tokens)
    wqkv_ref:   (E, 3E)     bf16
    bqkv_ref:   (1, 3E)     f32
    wprojh_ref: (H, D, E)   bf16  (wproj rows re-grouped per head)
    bproj_ref:  (1, E)      f32
    o_ref:      (N, E)      f32
    """
    E, H, D = EMB_SIZE, NUM_HEADS, HEAD_DIM
    N = x_ref.shape[0]
    inv_sqrt_e = 1.0 / (E ** 0.5)

    # QKV projection: one (N, E) x (E, 3E) MXU matmul, bf16 in / f32 acc.
    x_b = x_ref[...].astype(jnp.bfloat16)
    qkv_f32 = jnp.dot(x_b, wqkv_ref[...],
                      preferred_element_type=jnp.float32) + bqkv_ref[...]
    # Single bf16 cast of the whole tile; all per-head slices come from it.
    qkv = qkv_f32.astype(jnp.bfloat16)                               # (N, 3E)

    # Per-head scores: contract over D (layout 'qkv h d' along the lane axis).
    scores, vals = [], []
    for h in range(H):
        qh = qkv[:, 0 * E + h * D:0 * E + (h + 1) * D]               # (N, D)
        kh = qkv[:, 1 * E + h * D:1 * E + (h + 1) * D]               # (N, D)
        vh = qkv[:, 2 * E + h * D:2 * E + (h + 1) * D]               # (N, D)
        s = lax.dot_general(qh, kh,
                            dimension_numbers=(((1,), (1,)), ((), ())),
                            preferred_element_type=jnp.float32)      # (N, N)
        scores.append(s)
        vals.append(vh)

    # Softmax over the HEAD axis (torch F.softmax(..., dim=1) quirk), all f32;
    # the 1/sqrt(E) post-scale is folded into the reciprocal multiply.
    m = scores[0]
    for s in scores[1:]:
        m = jnp.maximum(m, s)
    exps = [jnp.exp(s - m) for s in scores]
    denom = exps[0]
    for e in exps[1:]:
        denom = denom + e
    inv = pl.reciprocal(denom, approx=True) * inv_sqrt_e             # (N, N)

    # TODO(synk): dropout has p=0 in the module -> identity, not implemented.

    # Output projection accumulated per head in-register (no VMEM scratch):
    #   y = bproj + sum_h (att_h @ v_h) @ wproj[h]
    y = jnp.zeros((N, E), jnp.float32)
    for h in range(H):
        ah = (exps[h] * inv).astype(jnp.bfloat16)                    # (N, N)
        out_h = jnp.dot(ah, vals[h],
                        preferred_element_type=jnp.float32)          # (N, D)
        y = y + jnp.dot(out_h.astype(jnp.bfloat16), wprojh_ref[h],
                        preferred_element_type=jnp.float32)          # (N, E)
    o_ref[...] = (y + bproj_ref[...]).astype(o_ref.dtype)


def multi_head_attention_block(x, wqkv, bqkv, wproj, bproj):
    """x: (B, N, E) f32. wqkv: (E, 3E), bqkv: (1, 3E), wproj: (E, E), bproj: (1, E)."""
    B, N, E = x.shape
    assert E == EMB_SIZE
    H, D = NUM_HEADS, HEAD_DIM

    # Fold (B, N, E) -> (B*N, E); per-batch (N, E) blocks are selected by the
    # grid.  Weights go in bf16 (f32 accumulation happens in-kernel); wproj is
    # re-grouped to (H, D, E) so the projection can be accumulated per head.
    x2d = x.reshape(B * N, E)
    wqkv_b = wqkv.astype(jnp.bfloat16)
    wprojh = wproj.reshape(H, D, E).astype(jnp.bfloat16)

    out2d = pl.pallas_call(
        mha_kernel,
        out_shape=jax.ShapeDtypeStruct((B * N, E), jnp.float32),
        grid_spec=pltpu.PrefetchScalarGridSpec(
            num_scalar_prefetch=0,
            grid=(B,),
            in_specs=[
                pl.BlockSpec((N, E), lambda b: (b, 0)),        # x tokens, per batch
                pl.BlockSpec((E, 3 * E), lambda b: (0, 0)),    # wqkv (resident)
                pl.BlockSpec((1, 3 * E), lambda b: (0, 0)),    # bqkv (resident)
                pl.BlockSpec((H, D, E), lambda b: (0, 0, 0)),  # wproj per head (resident)
                pl.BlockSpec((1, E), lambda b: (0, 0)),        # bproj (resident)
            ],
            out_specs=pl.BlockSpec((N, E), lambda b: (b, 0)),
        ),
        compiler_params=pltpu.CompilerParams(
            dimension_semantics=("parallel",)),                # v7x: one batch per TC
    )(x2d, wqkv_b, bqkv, wprojh, bproj)
    return out2d.reshape(B, N, E)


def reference(x, wqkv, bqkv, wproj, bproj):
    """Pure-JAX f32 mirror of the PyTorch forward (including the dim=1 softmax)."""
    B, N, E = x.shape
    H, D = NUM_HEADS, HEAD_DIM
    qkv = x @ wqkv + bqkv[0]                                  # (B, N, 3E)
    qkv = qkv.reshape(B, N, 3, H, D)                          # (qkv h d) split
    qkv = jnp.transpose(qkv, (2, 0, 3, 1, 4))                 # (3, B, H, N, D)
    q, k, v = qkv[0], qkv[1], qkv[2]
    s = jnp.einsum("bhqd,bhkd->bhqk", q, k)
    att = jax.nn.softmax(s, axis=1) / (E ** 0.5)              # softmax over heads!
    out = jnp.einsum("bhal,bhlv->bhav", att, v)               # (B, H, N, D)
    out = jnp.transpose(out, (0, 2, 1, 3)).reshape(B, N, E)   # 'b h n d -> b n (h d)'
    return out @ wproj + bproj[0]


if __name__ == "__main__":
    key = jax.random.PRNGKey(0)
    kx, k1, k2, k3, k4 = jax.random.split(key, 5)

    B, N, E = 2, 8, EMB_SIZE
    x = jax.random.normal(kx, (B, N, E), jnp.float32) * 0.1

    # PyTorch Linear stores (out, in); we pass the transposed (in, out) layout.
    wqkv = jax.random.normal(k1, (E, 3 * E), jnp.float32) * 0.05
    bqkv = jax.random.normal(k2, (1, 3 * E), jnp.float32) * 0.05
    wproj = jax.random.normal(k3, (E, E), jnp.float32) * 0.05
    bproj = jax.random.normal(k4, (1, E), jnp.float32) * 0.05

    out = multi_head_attention_block(x, wqkv, bqkv, wproj, bproj)
    out = jax.block_until_ready(out)

    ref = reference(x, wqkv, bqkv, wproj, bproj)
    np.testing.assert_allclose(np.asarray(out), np.asarray(ref),
                               rtol=5e-2, atol=5e-2)

    print("KERNEL_OK")
</pallas_src>

<mosaic_0001>
module attributes {stable_mosaic.version = 11 : i64} {
  func.func @mha_kernel(%arg0: i32, %arg1: memref<8x64xf32, #tpu.memory_space<vmem>>, %arg2: memref<64x192xbf16, #tpu.memory_space<vmem>>, %arg3: memref<1x192xf32, #tpu.memory_space<vmem>>, %arg4: memref<2x32x64xbf16, #tpu.memory_space<vmem>>, %arg5: memref<1x64xf32, #tpu.memory_space<vmem>>, %arg6: memref<8x64xf32, #tpu.memory_space<vmem>>) attributes {dimension_semantics = [#tpu.dimension_semantics<parallel>], iteration_bounds = array<i64: 2>, scalar_prefetch = 0 : i64, scratch_operands = 0 : i64, tpu.core_type = #tpu.core_type<tc>, window_params = [{transform_indices = @transform_0, window_bounds = array<i64: 8, 64>}, {pipeline_mode = #tpu.pipeline_mode<synchronous>, transform_indices = @transform_1, window_bounds = array<i64: 64, 192>}, {pipeline_mode = #tpu.pipeline_mode<synchronous>, transform_indices = @transform_2, window_bounds = array<i64: 1, 192>}, {pipeline_mode = #tpu.pipeline_mode<synchronous>, transform_indices = @transform_3, window_bounds = array<i64: 2, 32, 64>}, {pipeline_mode = #tpu.pipeline_mode<synchronous>, transform_indices = @transform_4, window_bounds = array<i64: 1, 64>}, {transform_indices = @transform_5, window_bounds = array<i64: 8, 64>}]} {
    %c0 = arith.constant 0 : index
    %c0_0 = arith.constant 0 : index
    %0 = vector.load %arg1[%c0, %c0_0] : memref<8x64xf32, #tpu.memory_space<vmem>>, vector<8x64xf32>
    %1 = arith.truncf %0 : vector<8x64xf32> to vector<8x64xbf16>
    %c0_1 = arith.constant 0 : index
    %c0_2 = arith.constant 0 : index
    %2 = vector.load %arg2[%c0_1, %c0_2] : memref<64x192xbf16, #tpu.memory_space<vmem>>, vector<64x192xbf16>
    %cst = arith.constant dense<0.000000e+00> : vector<8x192xf32>
    %3 = tpu.matmul %1, %2, %cst {dimension_numbers = #tpu.dot_dimension_numbers<[1], [0], [0], [1], [0, 0, 1, 1], [], []>} : vector<8x64xbf16>, vector<64x192xbf16>, vector<8x192xf32> -> vector<8x192xf32>
    %c0_3 = arith.constant 0 : index
    %c0_4 = arith.constant 0 : index
    %4 = vector.load %arg3[%c0_3, %c0_4] : memref<1x192xf32, #tpu.memory_space<vmem>>, vector<1x192xf32>
    %5 = vector.broadcast %4 : vector<1x192xf32> to vector<8x192xf32>
    %6 = arith.addf %3, %5 : vector<8x192xf32>
    %7 = arith.truncf %6 : vector<8x192xf32> to vector<8x192xbf16>
    %8 = vector.extract_strided_slice %7 {offsets = [0, 0], sizes = [8, 32], strides = [1, 1]} : vector<8x192xbf16> to vector<8x32xbf16>
    %9 = vector.extract_strided_slice %7 {offsets = [0, 64], sizes = [8, 32], strides = [1, 1]} : vector<8x192xbf16> to vector<8x32xbf16>
    %10 = vector.extract_strided_slice %7 {offsets = [0, 128], sizes = [8, 32], strides = [1, 1]} : vector<8x192xbf16> to vector<8x32xbf16>
    %cst_5 = arith.constant dense<0.000000e+00> : vector<8x8xf32>
    %11 = tpu.matmul %8, %9, %cst_5 {dimension_numbers = #tpu.dot_dimension_numbers<[1], [1], [0], [0], [0, 0, 1, 0], [], []>} : vector<8x32xbf16>, vector<8x32xbf16>, vector<8x8xf32> -> vector<8x8xf32>
    %12 = vector.extract_strided_slice %7 {offsets = [0, 32], sizes = [8, 32], strides = [1, 1]} : vector<8x192xbf16> to vector<8x32xbf16>
    %13 = vector.extract_strided_slice %7 {offsets = [0, 96], sizes = [8, 32], strides = [1, 1]} : vector<8x192xbf16> to vector<8x32xbf16>
    %14 = vector.extract_strided_slice %7 {offsets = [0, 160], sizes = [8, 32], strides = [1, 1]} : vector<8x192xbf16> to vector<8x32xbf16>
    %cst_6 = arith.constant dense<0.000000e+00> : vector<8x8xf32>
    %15 = tpu.matmul %12, %13, %cst_6 {dimension_numbers = #tpu.dot_dimension_numbers<[1], [1], [0], [0], [0, 0, 1, 0], [], []>} : vector<8x32xbf16>, vector<8x32xbf16>, vector<8x8xf32> -> vector<8x8xf32>
    %16 = arith.maximumf %11, %15 : vector<8x8xf32>
    %17 = arith.subf %11, %16 : vector<8x8xf32>
    %18 = math.exp %17 : vector<8x8xf32>
    %19 = arith.subf %15, %16 : vector<8x8xf32>
    %20 = math.exp %19 : vector<8x8xf32>
    %21 = arith.addf %18, %20 : vector<8x8xf32>
    %22 = tpu.reciprocal %21 {approx = true} : vector<8x8xf32> -> vector<8x8xf32>
    %cst_7 = arith.constant 1.250000e-01 : f32
    %23 = vector.broadcast %cst_7 : f32 to vector<8x8xf32>
    %24 = arith.mulf %22, %23 : vector<8x8xf32>
    %cst_8 = arith.constant 0.000000e+00 : f32
    %25 = vector.broadcast %cst_8 : f32 to vector<8x64xf32>
    %26 = arith.mulf %18, %24 : vector<8x8xf32>
    %27 = arith.truncf %26 : vector<8x8xf32> to vector<8x8xbf16>
    %cst_9 = arith.constant dense<0.000000e+00> : vector<8x32xf32>
    %28 = tpu.matmul %27, %10, %cst_9 {dimension_numbers = #tpu.dot_dimension_numbers<[1], [0], [0], [1], [0, 0, 1, 1], [], []>} : vector<8x8xbf16>, vector<8x32xbf16>, vector<8x32xf32> -> vector<8x32xf32>
    %29 = arith.truncf %28 : vector<8x32xf32> to vector<8x32xbf16>
    %c0_10 = arith.constant 0 : index
    %c0_11 = arith.constant 0 : index
    %c0_12 = arith.constant 0 : index
    %30 = vector.load %arg4[%c0_10, %c0_11, %c0_12] : memref<2x32x64xbf16, #tpu.memory_space<vmem>>, vector<1x32x64xbf16>
    %31 = vector.shape_cast %30 : vector<1x32x64xbf16> to vector<32x64xbf16>
    %cst_13 = arith.constant dense<0.000000e+00> : vector<8x64xf32>
    %32 = tpu.matmul %29, %31, %cst_13 {dimension_numbers = #tpu.dot_dimension_numbers<[1], [0], [0], [1], [0, 0, 1, 1], [], []>} : vector<8x32xbf16>, vector<32x64xbf16>, vector<8x64xf32> -> vector<8x64xf32>
    %33 = arith.addf %25, %32 : vector<8x64xf32>
    %34 = arith.mulf %20, %24 : vector<8x8xf32>
    %35 = arith.truncf %34 : vector<8x8xf32> to vector<8x8xbf16>
    %cst_14 = arith.constant dense<0.000000e+00> : vector<8x32xf32>
    %36 = tpu.matmul %35, %14, %cst_14 {dimension_numbers = #tpu.dot_dimension_numbers<[1], [0], [0], [1], [0, 0, 1, 1], [], []>} : vector<8x8xbf16>, vector<8x32xbf16>, vector<8x32xf32> -> vector<8x32xf32>
    %37 = arith.truncf %36 : vector<8x32xf32> to vector<8x32xbf16>
    %c1 = arith.constant 1 : index
    %c0_15 = arith.constant 0 : index
    %c0_16 = arith.constant 0 : index
    %38 = vector.load %arg4[%c1, %c0_15, %c0_16] : memref<2x32x64xbf16, #tpu.memory_space<vmem>>, vector<1x32x64xbf16>
    %39 = vector.shape_cast %38 : vector<1x32x64xbf16> to vector<32x64xbf16>
    %cst_17 = arith.constant dense<0.000000e+00> : vector<8x64xf32>
    %40 = tpu.matmul %37, %39, %cst_17 {dimension_numbers = #tpu.dot_dimension_numbers<[1], [0], [0], [1], [0, 0, 1, 1], [], []>} : vector<8x32xbf16>, vector<32x64xbf16>, vector<8x64xf32> -> vector<8x64xf32>
    %41 = arith.addf %33, %40 : vector<8x64xf32>
    %c0_18 = arith.constant 0 : index
    %c0_19 = arith.constant 0 : index
    %42 = vector.load %arg5[%c0_18, %c0_19] : memref<1x64xf32, #tpu.memory_space<vmem>>, vector<1x64xf32>
    %43 = vector.broadcast %42 : vector<1x64xf32> to vector<8x64xf32>
    %44 = arith.addf %41, %43 : vector<8x64xf32>
    %c0_20 = arith.constant 0 : index
    %c0_21 = arith.constant 0 : index
    %45 = vector.load %arg6[%c0_20, %c0_21] : memref<8x64xf32, #tpu.memory_space<vmem>>, vector<8x64xf32>
    tpu.vector_store %arg6[%c0_20, %c0_21], %44 {strides = array<i32>} : memref<8x64xf32, #tpu.memory_space<vmem>>, vector<8x64xf32>,
    return
  }
  func.func @transform_0(%arg0: i32) -> (i32, i32) {
    %c0_i32 = arith.constant 0 : i32
    %c0_i32_0 = arith.constant 0 : i32
    return %arg0, %c0_i32 : i32, i32
  }
  func.func @transform_1(%arg0: i32) -> (i32, i32) {
    %c0_i32 = arith.constant 0 : i32
    %c0_i32_0 = arith.constant 0 : i32
    %c0_i32_1 = arith.constant 0 : i32
    return %c0_i32, %c0_i32_0 : i32, i32
  }
  func.func @transform_2(%arg0: i32) -> (i32, i32) {
    %c0_i32 = arith.constant 0 : i32
    %c0_i32_0 = arith.constant 0 : i32
    %c0_i32_1 = arith.constant 0 : i32
    return %c0_i32, %c0_i32_0 : i32, i32
  }
  func.func @transform_3(%arg0: i32) -> (i32, i32, i32) {
    %c0_i32 = arith.constant 0 : i32
    %c0_i32_0 = arith.constant 0 : i32
    %c0_i32_1 = arith.constant 0 : i32
    %c0_i32_2 = arith.constant 0 : i32
    return %c0_i32, %c0_i32_0, %c0_i32_1 : i32, i32, i32
  }
  func.func @transform_4(%arg0: i32) -> (i32, i32) {
    %c0_i32 = arith.constant 0 : i32
    %c0_i32_0 = arith.constant 0 : i32
    %c0_i32_1 = arith.constant 0 : i32
    return %c0_i32, %c0_i32_0 : i32, i32
  }
  func.func @transform_5(%arg0: i32) -> (i32, i32) {
    %c0_i32 = arith.constant 0 : i32
    %c0_i32_0 = arith.constant 0 : i32
    return %arg0, %c0_i32 : i32, i32
  }
}

</mosaic_0001>

<bundles_post_ra>
// kernel: tpu_custom_call.1
= control target key start
LH: loop header
LB: loop body
LE: loop exit
PB: predicated region body
PF: predicated region fallthrough
CT: control target
= control target key end

     0   :  { %10 = vsyncpa [#allocation3], 0  ;;  %s1260_s0 = inlined_call_operand.hbm [shape: f32[16,64], index: 0, kind: input, shape index: {}]   ;;  %s1261_s1 = inlined_call_operand.hbm [shape: bf16[64,192], index: 1, kind: input, shape index: {}]   ;;  %s1262_s2 = inlined_call_operand.hbm [shape: f32[1,192], index: 2, kind: input, shape index: {}]   ;;  %s1263_s3 = inlined_call_operand.hbm [shape: bf16[2,32,64], index: 3, kind: input, shape index: {}]   ;;  %s1264_s4 = inlined_call_operand.vmem [shape: f32[1,64], index: 4, kind: input, shape index: {}]   ;;  %s1265_s5 = inlined_call_operand.hbm [shape: f32[16,64], index: 5, kind: output, shape index: {}]  }
   0x1   :  { %12 = vsyncpa [#allocation3 + $0x1], 0 }
   0x2   :  { %13 = vsyncpa [#allocation6], 0 }
   0x3   :  { %14 = vsyncpa [#allocation9], 0 }
   0x4   :  { %15 = vsyncpa [#allocation4], 0 }
   0x5   :  { %17 = vsyncpa [#allocation4 + $0x1], 0  ;;  %s1085_s18 = smov 0   ;;  %s1087_s19 = smov 0  }
   0x6   :  { %s1089_s20 = smov 0   ;;  %s1091_s21 = smov 0  }
   0x7 LB: > { %s175_s24 = sshll.u32 %s1261_s1, 4  ;;  %s1109_s25 = sadd.s32 4294967295, %s1043_s21   ;;  %s1043_s21 = sphi %s1091_s21, %s1276_s21   ;;  %s1039_s20 = sphi %s1089_s20, %s1275_s20   ;;  %s1035_s19 = sphi %s1087_s19, %s1274_s19   ;;  %s1031_s18 = sphi %s1085_s18, %s1273_s18   ;;  %s176_s24 = int_to_ptr.hbm [resolvable:$true] %s175_s24 }
   0x8   : > { %p673_p0 = scmp.ge.s32.totalorder %s1043_s21, 1  ;;  %p44_p1 = scmp.eq.s32.totalorder %s1109_s25, 0 }
   0x9   : > { %p164_p2 = scmp.lt.s32.totalorder %s1043_s21, 3  ;;  %s1045_s27 = smov [#allocation5]  }
   0xa   : > { %s177_s28 = sshll.u32 %s1045_s27, 4  ;;  %s190_s6 = sshll.u32 %s1262_s2, 4  ;;  %s178_s28 = int_to_ptr.vmem [resolvable:$true] %s177_s28  ;;  %s191_s6 = int_to_ptr.hbm [resolvable:$true] %s190_s6 }
   0xb   : > { %p1114_p3 = pnand %p673_p0, %p164_p2  ;;  %s201_s10 = sshll.u32 %s1263_s3, 4  ;;  %s202_s10 = int_to_ptr.hbm [resolvable:$true] %s201_s10 }
   0xc   : > { %s1046_s11 = smov [#allocation7]   ;;  %s1047_s13 = smov 128  }
   0xd   : > { %p774_p4 = pneg %p1114_p3  ;;  %s192_s12 = sshll.u32 %s1046_s11, 4  ;;  %s193_s12 = int_to_ptr.vmem [resolvable:$true] %s192_s12 }
   0xe   : > { %s1048_s14 = smov 8   ;;  %s1049_s15 = smov [#allocation8]  }
   0xf   : > { %p1126_p6 = pnand %p774_p4, %p44_p1  ;;  %s203_s16 = sshll.u32 %s1049_s15, 4  ;;  %s204_s16 = int_to_ptr.vmem [resolvable:$true] %s203_s16 }
  0x10   : > { %s1050_s17 = smov 64   ;;  %s1051_s22 = smov 4  }
  0x11   : > { %777 = dma.hbm_to_vmem [thread:$0]  (!%p1126_p6), %s176_s24, 1024, %s178_s28, [#allocation6], %s1047_s13, %s1047_s13, %s1048_s14  }
  0x12   : > { %780 = dma.hbm_to_vmem [thread:$0]  (!%p1126_p6), %s191_s6, 32, %s193_s12, [#allocation6]  }
  0x13   : > { %783 = dma.hbm_to_vmem [thread:$0]  (!%p1126_p6), %s202_s10, 512, %s204_s16, [#allocation9], %s1050_s17, %s1050_s17, %s1051_s22  }
  0x14   : > { %s672_s23 = sadd.s32 4294967294, %s1043_s21   ;;  %s1141_s24 = sadd.s32 1, %s1043_s21  }
  0x15   : > { %s30_s27 = sadd.s32 1, %s1039_s20  ;;  %s27_s28 = ssub.s32 %s1043_s21, %s1141_s24 }
  0x16   : > { %p37_p7 = scmp.ne.s32.totalorder %s1039_s20, %s1035_s19  ;;  %p28_p8 = scmp.eq.s32.totalorder %s27_s28, 0 }
  0x17   : > { %p38_p9 = scmp.eq.s32.totalorder %s1043_s21, 0  ;;  %p43_p10 = scmp.ne.s32.totalorder %s1035_s19, %s1031_s18 }
  0x18   : > { %p151_p11 = scmp.eq.s32.totalorder %s1109_s25, 1  ;;  %p157_p0 = scmp.eq.s32.totalorder %s672_s23, 1 }
  0x19   : > { %s1153_s29 = scalar_select %p28_p8, %s1039_s20, %s30_s27  }
  0x1a   : > { %p1157_p12 = por %p44_p1, %p43_p10  ;;  %p1161_p13 = por %p151_p11, %p37_p7 }
  0x1b   : > { %p39_p2 = por %p38_p9, %p37_p7  ;;  %s220_s7 = sand.u32 1, %s1039_s20  }
  0x1c   : > { %p1166_p4 = por %p157_p0, %p43_p10  ;;  %p795_p6 = scmp.lt.s32.totalorder %s1043_s21, 2 }
  0x1d   : > { %s678_s9 = sshll.u32 %s220_s7, 3  ;;  %s679_s10 = sshll.u32 %s1043_s21, 3 }
  0x1e   : > { %s228_s13 = scalar_lea.hbm %s1260_s0, %s679_s10  ;;  %s224_s15 = scalar_lea.vmem [#allocation2], %s678_s9 }
  0x1f   : > { %s230_s14 = sshll.u32 %s228_s13, 4  ;;  %s232_s16 = sshll.u32 %s224_s15, 4  ;;  %s231_s14 = int_to_ptr.hbm [resolvable:$true] %s230_s14  ;;  %s233_s16 = int_to_ptr.vmem [resolvable:$true] %s232_s16 }
  0x20   : > { %p1175_p8 = pnand %p795_p6, %p39_p2  ;;  %s221_s22 = scalar_lea.sflag [#allocation3], %s220_s7 }
  0x21   : > { %s939_s23 = sshra.s32 %s231_s14, 4  ;;  %s946_s9 = scalar_lea.hbm %s1260_s0, 16  ;;  %s940_s23 = int_to_ptr.hbm [resolvable:$true] %s939_s23 }
  0x22   : > { %s941_s27 = scalar_lea.hbm %s940_s23, 8  ;;  %p943_p9 = pneg %p1175_p8 }
  0x23   : > { %p942_p7 = scmp.ne.s32.totalorder %s940_s23, %s941_s27  ;;  %p947_p0 = scmp.lt.s32.totalorder %s940_s23, %s1260_s0 }
  0x24   : > { %p948_p2 = scmp.lt.s32.totalorder %s946_s9, %s941_s27 }
  0x25   : > { %p944_p10 = pnand %p943_p9, %p942_p7 }
  0x26   : > { %p949_p6 = por %p948_p2, %p947_p0 }
  0x27   : > { %p945_p11 = pneg %p944_p10 }
  0x29   : > { %p950_p5 = pnand %p949_p6, %p945_p11 }
  0x2b   : > { %953 = shalt.err (!%p950_p5)
}
  0x2c   : > { %787 = dma.hbm_to_vmem [thread:$0]  (!%p1175_p8), %s231_s14, 128, %s233_s16, %s221_s22  }
  0x2d   : > { %241 = sbr.rel (%p1114_p3) target bundleno = 768 (0x300), region = 40  ;;  %s1192_s7 = sand.u32 (!%p1114_p3), 1, %s1035_s19  }
  0x2e   : > { %s681_s13 = sshll.u32 (!%p1114_p3), %s1192_s7, 3  ;;  %s244_s15 = scalar_lea.sflag (!%p1114_p3), [#allocation3], %s1192_s7 }
  0x2f   : > { %s1198_s23 = scalar_lea.vmem (!%p1114_p3), [#allocation2], %s681_s13 }
  0x32   : > { %1014 = dma.done.wait (%p1157_p12), %s244_s15, 128  }
  0x33   : > { %1016 = vsyncadd (%p1157_p12), %s244_s15, 4294967168 }
  0x34   : > { %1018 = dma.done.wait (%p44_p1), [#allocation6], 1056  }
  0x35   : > { %1020 = vsyncadd (%p44_p1), [#allocation6], 4294966240 }
  0x36   : > { %1022 = dma.done.wait (%p44_p1), [#allocation9], 512  }
  0x37   : > { %1024 = vsyncadd (%p44_p1), [#allocation9], 4294966784  ;;  %v712_v0 = vld [vmem:[#allocation5 + $0x30] sm:$0xf]  ;;  %v753_v1 = vld [vmem:[#allocation5 + $0x34] sm:$0xf0] }
  0x38   : > { %v752_v2 = vld [vmem:[#allocation5 + $0x34] sm:$0xf]  ;;  %v713_v3 = vor.u32 %v753_v1, %v712_v0  ;;  %v714_v4 = vld [vmem:[#allocation5 + $0x38] sm:$0xf0]  ;;  %v704_v5 = vld [vmem:[#allocation5 + $0x20] sm:$0xf] }
  0x39   : > { %v751_v6 = vld [vmem:[#allocation5 + $0x24] sm:$0xf0]  ;;  %v717_v7 = vor.u32 %v752_v2, %v714_v4  ;;  %v750_v8 = vld [vmem:[#allocation5 + $0x24] sm:$0xf]  ;;  %v706_v9 = vld [vmem:[#allocation5 + $0x28] sm:$0xf0] }
  0x3a   : > { %355 = vmatpush.bf16.msra.mxu0 %v713_v3  ;;  %v705_v10 = vor.u32 %v751_v6, %v704_v5  ;;  %v709_v11 = vor.u32 %v750_v8, %v706_v9  ;;  %v696_v12 = vld [vmem:[#allocation5 + $0x10] sm:$0xf]  ;;  %v749_v13 = vld [vmem:[#allocation5 + $0x14] sm:$0xf0]  ;;  %v748_v14 = vld [vmem:[#allocation5 + $0x14] sm:$0xf] }
  0x3b   : > { %368 = vmatpush.bf16.msra.mxu1 %v717_v7  ;;  %v698_v15 = vld [vmem:[#allocation5 + $0x18] sm:$0xf0]  ;;  %v697_v16 = vor.u32 %v749_v13, %v696_v12  ;;  %v688_v18 = vld [vmem:[#allocation5] sm:$0xf]  ;;  %v747_v19 = vld [vmem:[#allocation5 + $0x4] sm:$0xf0] }
  0x3c   : > { %v701_v17 = vor.u32 %v748_v14, %v698_v15  ;;  %v746_v20 = vld [vmem:[#allocation5 + $0x4] sm:$0xf]  ;;  %v690_v21 = vld [vmem:[#allocation5 + $0x8] sm:$0xf0]  ;;  %v689_v22 = vor.u32 %v747_v19, %v688_v18  ;;  %v291_v23 = vld [vmem:[%s1198_s23] sm:$0xff]  ;;  %vm347_vm0 = vcmask 523264  }
  0x3d   : > { %v693_v24 = vor.u32 %v746_v20, %v690_v21  ;;  %v292_v25 = vpack.c.bf16 %v291_v23, %v291_v23  ;;  %v301_v26 = vld [vmem:[#allocation7] sm:$0x3]  ;;  %s1052_s26 = smov 96   ;;  %s1053_s30 = smov 64   ;;  %vm383_vm1 = vcmask 261120   ;;  %vm444_vm2 = vcmask 1043456  }
  0x3e   : > { %356 = vmatpush.bf16.msra.mxu0 %v705_v10  ;;  %v303_v27 = vperm.slane %v301_v26, 0  ;;  %v304_v28 = vperm.slane %v301_v26, 1  ;;  %s1054_s14 = smov 32   ;;  %v757_v49 = vld [vmem:[#allocation8 + $0x18] sm:$0xff]  ;;  %v755_v50 = vld [vmem:[#allocation8 + $0x8] sm:$0xff]  ;;  %v756_v53 = vld [vmem:[#allocation8 + $0x10] sm:$0xff] }
  0x3f   : > { %369 = vmatpush.bf16.msra.mxu1 %v709_v11  ;;  %v754_v54 = vld [vmem:[#allocation8] sm:$0xff]  ;;  %vm440_vm3 = vcmask 64512   ;;  %s743_s16 = sshll.u32 %s1109_s25, 3  ;;  %v842_v12 = vld [vmem:[%s1264_s4] ss:$0 sm:$0xff]  ;;  %s289_s9 = scalar_lea.vmem [#allocation10], %s681_s13 }
  0x40   : > { %s568_s27 = scalar_lea.hbm %s1265_s5, %s743_s16  ;;  %s570_s11 = sshll.u32 %s289_s9, 4  ;;  %s571_s11 = int_to_ptr.vmem [resolvable:$true] %s570_s11 }
  0x41   : > { %s572_s12 = sshll.u32 %s568_s27, 4  ;;  %s558_s25 = scalar_lea.sflag [#allocation4], %s1192_s7  ;;  %s573_s12 = int_to_ptr.hbm [resolvable:$true] %s572_s12 }
  0x42   : > { %357 = vmatpush.bf16.msra.mxu0 %v697_v16  ;;  %s983_s15 = sshra.s32 %s573_s12, 4  ;;  %s989_s13 = scalar_lea.hbm %s1265_s5, 16  ;;  %s984_s15 = int_to_ptr.hbm [resolvable:$true] %s983_s15 }
  0x43   : > { %370 = vmatpush.bf16.msra.mxu1 %v701_v17  ;;  %s985_s23 = scalar_lea.hbm %s984_s15, 8  ;;  %p990_p12 = scmp.lt.s32.totalorder %s984_s15, %s1265_s5 }
  0x44   : > { %p986_p1 = scmp.ne.s32.totalorder %s984_s15, %s985_s23  ;;  %p991_p8 = scmp.lt.s32.totalorder %s989_s13, %s985_s23 }
  0x46   : > { %358 = vmatpush.bf16.msra.mxu0 %v689_v22  ;;  %p987_p3 = pnand %p986_p1, %p1161_p13  ;;  %p992_p7 = por %p991_p8, %p990_p12 }
  0x47   : > { %371 = vmatpush.bf16.msra.mxu1 %v693_v24 }
  0x48   : > { %p988_p5 = pneg %p987_p3 }
  0x49   : > { %718 = vmatmul.msk.bf16.vlgmr.msra.gmra.mxu0 %vm347_vm0, %v292_v25 }
  0x4a   : > { %719 = vmatmul.msk.bf16.vlgmr.msra.gmra.mxu1 %vm347_vm0, %v292_v25  ;;  %516 = vmatpush.bf16.msrb.mxu0 %v757_v49  ;;  %p993_p9 = pnand %p992_p7, %p988_p5 }
  0x4b   : > { %544 = vmatpush.bf16.msrb.mxu1 %v755_v50 }
  0x4e   : > { %517 = vmatpush.bf16.msrb.mxu0 %v756_v53 }
  0x4f   : > { %545 = vmatpush.bf16.msrb.mxu1 %v754_v54 }
  0xc6   : > { %v360_v29 = vpop.f32.mrf.mxu0 }
  0xc7   : > { %v361_v30 = vadd.f32 %v360_v29, %v303_v27  ;;  %v373_v31 = vpop.f32.mrf.mxu1 }
  0xc8   : > { %v374_v32 = vadd.f32 %v373_v31, %v304_v28 }
  0xca   : > { %v377_v33 = vpack.c.bf16 %v374_v32, %v361_v30 }
  0xcc   : > { %v379_v34 = vunpack.c.l.b16 %v377_v33  ;;  %v438_v38 = vunpack.c.h.b16 %v377_v33 }
  0xce   : > { %v362_v35 = vpop.f32.mrf.mxu0  ;;  %v380_v36 = vpack.c.b16 %v379_v34, %v379_v34  ;;  %v439_v39 = vpack.c.b16 %v438_v38, %v438_v38 }
  0xcf   : > { %v375_v37 = vpop.f32.mrf.mxu1 }
  0xd0   : > { %403 = vrot.lane.b32.xlu1 %v380_v36, %s1052_s26  ;;  %381 = vrot.lane.b32.xlu0 %v380_v36, %s1053_s30  ;;  %v446_v43 = vsel %vm444_vm2, %v439_v39, 0 }
  0xd8   : > { %468 = vrot.lane.b32.xlu1 %v439_v39, %s1052_s26  ;;  %405 = vrot.lane.b32.xlu0 %v380_v36, %s1054_s14 }
 0x142   : > { %v404_v40 = vpop.permute.xlu1 %403  ;;  %v382_v41 = vpop.permute.xlu0 %381 }
 0x143   : > { %v388_v42 = vsel %vm383_vm1, %v382_v41, 0 }
 0x144   : > { %397 = vmatpush.bf16.xpose.msra.mxu2 %v388_v42 }
 0x14a   : > { %v469_v44 = vpop.permute.xlu1 %468  ;;  %v406_v45 = vpop.permute.xlu0 %405 }
 0x14b   : > { %720 = vmatmul.msk.bf16.vlgmr.msra.gmra.mxu2 %vm383_vm1, %v377_v33  ;;  %v411_v46 = vsel %vm383_vm1, %v406_v45, 0  ;;  %v474_v47 = vsel %vm444_vm2, %v469_v44, 0 }
 0x14c   : > { %455 = vmatpush.bf16.msrb.mxu2 %v446_v43  ;;  %420 = vmatpush.bf16.xpose.msra.mxu3 %v411_v46 }
 0x153   : > { %721 = vmatmul.msk.bf16.vlgmr.msra.gmra.mxu3 %vm383_vm1, %v404_v40 }
 0x154   : > { %483 = vmatpush.bf16.msrb.mxu3 %v474_v47 }
 0x1ce   : > { %v399_v48 = vpop.f32.mrf.mxu2 }
 0x1d6   : > { %v401_v51 = vpop.f32.mrf.mxu2  ;;  %v422_v52 = vpop.f32.mrf.mxu3 }
 0x1d7   : > { %v426_v55 = vmax.f32 %v399_v48, %v422_v52 }
 0x1d9   : > { %v427_v56 = vsub.f32 %v399_v48, %v426_v55  ;;  %v430_v57 = vsub.f32 %v422_v52, %v426_v55 }
 0x1db   : > { %v428_v58 = vmul.f32 1.442695, %v427_v56  ;;  %v431_v59 = vmul.f32 1.442695, %v430_v57 }
 0x1dd   : > { %843 = vpow2.f32 %v428_v58 }
 0x1de   : > { %845 = vpow2.f32 %v431_v59  ;;  %v424_v60 = vpop.f32.mrf.mxu3 }
 0x1e3   : > { %v844_v61 = vpop.eup %843 }
 0x1e4   : > { %v846_v62 = vpop.eup %845 }
 0x1e5   : > { %v433_v63 = vadd.f32 %v846_v62, %v844_v61 }
 0x1e7   : > { %847 = vrcp.f32 %v433_v63 }
 0x1ed   : > { %v848_v0 = vpop.eup %847 }
 0x1ee   : > { %v435_v1 = vmul.f32 0.125, %v848_v0 }
 0x1f0   : > { %v436_v2 = vmul.f32 %v844_v61, %v435_v1  ;;  %v466_v3 = vmul.f32 %v846_v62, %v435_v1 }
 0x1f2   : > { %v437_v4 = vpack.c.bf16 %v436_v2, %v436_v2  ;;  %v467_v5 = vpack.c.bf16 %v466_v3, %v466_v3 }
 0x1f4   : > { %722 = vmatmul.msk.bf16.vlgmr.msrb.gmra.mxu2 %vm440_vm3, %v437_v4  ;;  %723 = vmatmul.msk.bf16.vlgmr.msrb.gmra.mxu3 %vm440_vm3, %v467_v5 }
 0x277   : > { %v457_v6 = vpop.f32.mrf.mxu2  ;;  %v485_v7 = vpop.f32.mrf.mxu3 }
 0x278   : > { %v461_v8 = vpack.c.bf16 %v457_v6, %v457_v6  ;;  %v489_v9 = vpack.c.bf16 %v485_v7, %v485_v7 }
 0x27a   : > { %732 = vmatmul.msk.bf16.vlgmr.msrb.gmra.mxu0 %vm383_vm1, %v489_v9  ;;  %741 = vmatmul.msk.bf16.vlgmr.msrb.gmra.mxu1 %vm383_vm1, %v461_v8 }
 0x27f   : > { %v459_v10 = vpop.f32.mrf.mxu2  ;;  %v487_v11 = vpop.f32.mrf.mxu3 }
 0x2f7   : > { %v519_v13 = vpop.f32.mrf.mxu0  ;;  %v547_v14 = vpop.f32.mrf.mxu1 }
 0x2f8   : > { %v548_v15 = vadd.f32 %v547_v14, %v519_v13 }
 0x2fa   : > { %v555_v16 = vadd.f32 %v842_v12, %v548_v15 }
 0x2fc   : > { %556 = vst.msk [vmem:[%s289_s9] sm:$0xff] %vm347_vm0, %v555_v16 }
 0x2fd   : > { %996 = shalt.err (!%p993_p9)
}
 0x2fe   : > { %772 = dma.vmem_to_hbm [thread:$0]  (%p1161_p13), %s571_s11, 128, %s573_s12, %s558_s25  }
 0x2ff   : > { %v521_v17 = vpop.f32.mrf.mxu0  ;;  %v549_v18 = vpop.f32.mrf.mxu1 }
 0x300 PF: > { %s584_s7 = sand.u32 1, %s1031_s18   ;;  %p1272_p10 = scmp.ge.s32.totalorder %s1043_s21, 2 }
 0x301   : > { %s585_s17 = scalar_lea.sflag [#allocation4], %s584_s7 }
 0x302   : > { %p789_p11 = pnand %p1272_p10, %p1166_p4 }
 0x304   : > { %p790_p0 = pneg %p789_p11 }
 0x306   : > { %1026 = dma.done.wait (%p790_p0), %s585_s17, 128  }
 0x307   : > { %1028 = vsyncadd (%p790_p0), %s585_s17, 4294967168  ;;  %p20_p13 = scmp.ge.s32.totalorder %s1141_s24, 4   ;;  %s1273_s18 = smov %s1035_s19 }
 0x308   : > { %s1274_s19 = smov %s1039_s20  ;;  %s1275_s20 = smov %s1153_s29 }
 0x309   : > { %s1276_s21 = smov %s1141_s24  ;;  %22 = sbr.rel (!%p20_p13) target bundleno = 7 (0x7), region = 98 }
 0x30e   :  { %591 = vsyncpa [#allocation3], 1 }
 0x30f   :  { %593 = vsyncpa [#allocation3 + $0x1], 1 }
 0x310   :  { %594 = vsyncpa [#allocation6], 1 }
 0x311   :  { %595 = vsyncpa [#allocation9], 1 }
 0x312   :  { %596 = vsyncpa [#allocation4], 1 }
 0x313   :  { %598 = vsyncpa [#allocation4 + $0x1], 1 }

</bundles_post_ra>
